<compile_context>
chip_gen: v7x
topology: tpu7x:2x2x1
jax: 0.10.0
libtpu: 0.0.40
codegen_flags: <defaults>
</compile_context>

<pallas_src>
import functools

import jax
import jax.numpy as jnp
from jax import lax
from jax.experimental import pallas as pl
from jax.experimental.pallas import tpu as pltpu


def _multitask_loss_kernel(
    w_ref,                                   # (1,) f32 in SMEM
    ps_ref, ls_ref, pf_ref, lf_ref,          # (TM, D) f32 tiles in VMEM
    out_ref,                                 # (1, 1) f32 output (resident)
    acc_s_ref, acc_f_ref,                    # (TM, D) f32 VMEM accumulators
    *, n_rows, tm, inv_n_s, inv_n_f, needs_mask,
):
    i = pl.program_id(0)

    @pl.when(i == 0)
    def _init():
        acc_s_ref[...] = jnp.zeros_like(acc_s_ref)
        acc_f_ref[...] = jnp.zeros_like(acc_f_ref)

    d_s = (ps_ref[...] - ls_ref[...]).astype(jnp.float32)
    d_f = (pf_ref[...] - lf_ref[...]).astype(jnp.float32)
    sq_s = d_s * d_s
    sq_f = d_f * d_f

    if needs_mask:  # static: only emitted when n_rows % tm != 0
        row = i * tm + lax.broadcasted_iota(jnp.int32, sq_s.shape, 0)
        valid = row < n_rows
        sq_s = jnp.where(valid, sq_s, 0.0)   # select: padding garbage can't leak
        sq_f = jnp.where(valid, sq_f, 0.0)

    # Steady state: elementwise accumulate only (vld + VALU); no per-tile
    # reduce-to-scalar serialization.
    acc_s_ref[...] += sq_s
    acc_f_ref[...] += sq_f

    @pl.when(i == pl.num_programs(0) - 1)
    def _finalize():
        # Lane reduction (XLU) then sublane/row reduction -> (1, 1), once.
        sse_s = jnp.sum(jnp.sum(acc_s_ref[...], axis=-1, keepdims=True),
                        axis=0, keepdims=True)
        sse_f = jnp.sum(jnp.sum(acc_f_ref[...], axis=-1, keepdims=True),
                        axis=0, keepdims=True)
        loss_s = sse_s * inv_n_s
        loss_f = sse_f * inv_n_f

        w = w_ref[0]                          # SMEM scalar read
        prec_s = jnp.exp(-w)                  # alpha
        prec_f = jnp.exp(w)                   # exact 1/prec_s, no f32 divide
        out_ref[...] = (prec_s * loss_s + prec_f * loss_f).astype(out_ref.dtype)


def multitask_loss(pred_s, label_s, pred_f, label_f, weights, *, tm=512):
    """Fused uncertainty-weighted two-task MSE loss.

    pred_s/label_s/pred_f/label_f: (N, D) float32 arrays (same shape).
    weights: the scalar nn.Parameter, passed as a (1,) float32 array.

    VMEM budget note (v7x has 64 MiB/TC): 4 input streams x 2 pipeline buffers
    x tm x D x 4B must stay well under the scoped limit — halve `tm` on v7x
    relative to v5e/v6e for very wide D.
    """
    assert pred_s.shape == label_s.shape
    assert pred_f.shape == label_f.shape
    assert pred_s.shape == pred_f.shape, "both task pairs share one row grid"
    n_rows, d = pred_s.shape

    if tm >= n_rows:
        tm = n_rows                           # single tile == full array dim
    else:
        assert tm % 8 == 0, "row tile must be sublane-aligned"

    grid = (pl.cdiv(n_rows, tm),)
    needs_mask = (n_rows % tm) != 0

    # nn.MSELoss normalizes each loss by its own numel.
    inv_n_s = 1.0 / float(pred_s.size)
    inv_n_f = 1.0 / float(pred_f.size)

    kernel = functools.partial(
        _multitask_loss_kernel,
        n_rows=n_rows, tm=tm, inv_n_s=inv_n_s, inv_n_f=inv_n_f,
        needs_mask=needs_mask)

    def tile_spec():
        return pl.BlockSpec((tm, d), lambda i: (i, 0))

    n = pred_s.size
    cost = pl.CostEstimate(flops=6 * n, transcendentals=2,
                           bytes_accessed=16 * n + 8)

    out = pl.pallas_call(
        kernel,
        grid=grid,
        in_specs=[
            pl.BlockSpec(memory_space=pltpu.MemorySpace.SMEM),   # weights
            tile_spec(), tile_spec(), tile_spec(), tile_spec(),
        ],
        out_specs=pl.BlockSpec((1, 1), lambda i: (0, 0)),
        out_shape=jax.ShapeDtypeStruct((1, 1), jnp.float32),
        scratch_shapes=[
            pltpu.VMEM((tm, d), jnp.float32),
            pltpu.VMEM((tm, d), jnp.float32),
        ],
        compiler_params=pltpu.CompilerParams(
            dimension_semantics=("arbitrary",)),   # reduction axis
        cost_estimate=cost,
    )(weights, pred_s, label_s, pred_f, label_f)
    return out[0, 0]


def _reference(pred_s, label_s, pred_f, label_f, w):
    loss_s = jnp.mean((pred_s - label_s) ** 2)
    loss_f = jnp.mean((pred_f - label_f) ** 2)
    p_s = jnp.exp(-w)
    return p_s * loss_s + (1.0 / p_s) * loss_f


if __name__ == "__main__":
    key = jax.random.PRNGKey(0)
    k1, k2, k3, k4 = jax.random.split(key, 4)

    # Small, lane-dense shapes; N=20 with TM=8 exercises the partial-tile mask.
    N, D = 20, 128
    pred_s = jax.random.normal(k1, (N, D), jnp.float32)
    label_s = jax.random.normal(k2, (N, D), jnp.float32)
    pred_f = jax.random.normal(k3, (N, D), jnp.float32)
    label_f = jax.random.normal(k4, (N, D), jnp.float32)
    weights = jnp.array([0.3], jnp.float32)   # nn.Parameter (scalar)

    loss = multitask_loss(pred_s, label_s, pred_f, label_f, weights, tm=8)
    jax.block_until_ready(loss)

    expected = _reference(pred_s, label_s, pred_f, label_f, weights[0])
    assert loss.shape == ()
    assert jnp.allclose(loss, expected, rtol=1e-5, atol=1e-5), (loss, expected)

    print("KERNEL_OK")
</pallas_src>

<mosaic_0001>
module attributes {stable_mosaic.version = 11 : i64} {
  func.func @_multitask_loss_kernel(%arg0: i32, %arg1: memref<1xf32, #tpu.memory_space<smem>>, %arg2: memref<8x128xf32, #tpu.memory_space<vmem>>, %arg3: memref<8x128xf32, #tpu.memory_space<vmem>>, %arg4: memref<8x128xf32, #tpu.memory_space<vmem>>, %arg5: memref<8x128xf32, #tpu.memory_space<vmem>>, %arg6: memref<1x1xf32, #tpu.memory_space<vmem>>, %arg7: memref<8x128xf32, #tpu.memory_space<vmem>>, %arg8: memref<8x128xf32, #tpu.memory_space<vmem>>) attributes {dimension_semantics = [#tpu.dimension_semantics<arbitrary>], iteration_bounds = array<i64: 3>, scalar_prefetch = 0 : i64, scratch_operands = 2 : i64, tpu.core_type = #tpu.core_type<tc>, window_params = [{transform_indices = @transform_0, window_bounds = array<i64: 1>}, {transform_indices = @transform_1, window_bounds = array<i64: 8, 128>}, {transform_indices = @transform_2, window_bounds = array<i64: 8, 128>}, {transform_indices = @transform_3, window_bounds = array<i64: 8, 128>}, {transform_indices = @transform_4, window_bounds = array<i64: 8, 128>}, {pipeline_mode = #tpu.pipeline_mode<synchronous>, transform_indices = @transform_5, window_bounds = array<i64: 1, 1>}]} {
    %c0_i32 = arith.constant 0 : i32
    %0 = arith.cmpi eq, %arg0, %c0_i32 : i32
    %1 = arith.extui %0 : i1 to i32
    %c0_i32_0 = arith.constant 0 : i32
    %2 = arith.cmpi ne, %1, %c0_i32_0 : i32
    scf.if %2 {
      %cst_18 = arith.constant 0.000000e+00 : f32
      %30 = vector.broadcast %cst_18 : f32 to vector<8x128xf32>
      %c0_19 = arith.constant 0 : index
      %c0_20 = arith.constant 0 : index
      %31 = vector.load %arg7[%c0_19, %c0_20] : memref<8x128xf32, #tpu.memory_space<vmem>>, vector<8x128xf32>
      tpu.vector_store %arg7[%c0_19, %c0_20], %30 {strides = array<i32>} : memref<8x128xf32, #tpu.memory_space<vmem>>, vector<8x128xf32>,
      %cst_21 = arith.constant 0.000000e+00 : f32
      %32 = vector.broadcast %cst_21 : f32 to vector<8x128xf32>
      %c0_22 = arith.constant 0 : index
      %c0_23 = arith.constant 0 : index
      %33 = vector.load %arg8[%c0_22, %c0_23] : memref<8x128xf32, #tpu.memory_space<vmem>>, vector<8x128xf32>
      tpu.vector_store %arg8[%c0_22, %c0_23], %32 {strides = array<i32>} : memref<8x128xf32, #tpu.memory_space<vmem>>, vector<8x128xf32>,
    } else {
    }
    %c0 = arith.constant 0 : index
    %c0_1 = arith.constant 0 : index
    %3 = vector.load %arg2[%c0, %c0_1] : memref<8x128xf32, #tpu.memory_space<vmem>>, vector<8x128xf32>
    %c0_2 = arith.constant 0 : index
    %c0_3 = arith.constant 0 : index
    %4 = vector.load %arg3[%c0_2, %c0_3] : memref<8x128xf32, #tpu.memory_space<vmem>>, vector<8x128xf32>
    %5 = arith.subf %3, %4 : vector<8x128xf32>
    %c0_4 = arith.constant 0 : index
    %c0_5 = arith.constant 0 : index
    %6 = vector.load %arg4[%c0_4, %c0_5] : memref<8x128xf32, #tpu.memory_space<vmem>>, vector<8x128xf32>
    %c0_6 = arith.constant 0 : index
    %c0_7 = arith.constant 0 : index
    %7 = vector.load %arg5[%c0_6, %c0_7] : memref<8x128xf32, #tpu.memory_space<vmem>>, vector<8x128xf32>
    %8 = arith.subf %6, %7 : vector<8x128xf32>
    %9 = arith.mulf %5, %5 : vector<8x128xf32>
    %10 = arith.mulf %8, %8 : vector<8x128xf32>
    %c8_i32 = arith.constant 8 : i32
    %11 = arith.muli %arg0, %c8_i32 : i32
    %12 = tpu.iota {dimensions = array<i32: 0>} : vector<8x128xi32>
    %13 = vector.broadcast %11 : i32 to vector<8x128xi32>
    %14 = arith.addi %13, %12 : vector<8x128xi32>
    %c20_i32 = arith.constant 20 : i32
    %15 = vector.broadcast %c20_i32 : i32 to vector<8x128xi32>
    %16 = arith.cmpi slt, %14, %15 : vector<8x128xi32>
    %cst = arith.constant 0.000000e+00 : f32
    %17 = vector.broadcast %cst : f32 to vector<8x128xf32>
    %18 = arith.select %16, %9, %17 : vector<8x128xi1>, vector<8x128xf32>
    %cst_8 = arith.constant 0.000000e+00 : f32
    %19 = vector.broadcast %cst_8 : f32 to vector<8x128xf32>
    %20 = arith.select %16, %10, %19 : vector<8x128xi1>, vector<8x128xf32>
    %c0_9 = arith.constant 0 : index
    %c0_10 = arith.constant 0 : index
    %21 = vector.load %arg7[%c0_9, %c0_10] : memref<8x128xf32, #tpu.memory_space<vmem>>, vector<8x128xf32>
    %22 = arith.addf %21, %18 : vector<8x128xf32>
    %c0_11 = arith.constant 0 : index
    %c0_12 = arith.constant 0 : index
    %23 = vector.load %arg7[%c0_11, %c0_12] : memref<8x128xf32, #tpu.memory_space<vmem>>, vector<8x128xf32>
    tpu.vector_store %arg7[%c0_11, %c0_12], %22 {strides = array<i32>} : memref<8x128xf32, #tpu.memory_space<vmem>>, vector<8x128xf32>,
    %c0_13 = arith.constant 0 : index
    %c0_14 = arith.constant 0 : index
    %24 = vector.load %arg8[%c0_13, %c0_14] : memref<8x128xf32, #tpu.memory_space<vmem>>, vector<8x128xf32>
    %25 = arith.addf %24, %20 : vector<8x128xf32>
    %c0_15 = arith.constant 0 : index
    %c0_16 = arith.constant 0 : index
    %26 = vector.load %arg8[%c0_15, %c0_16] : memref<8x128xf32, #tpu.memory_space<vmem>>, vector<8x128xf32>
    tpu.vector_store %arg8[%c0_15, %c0_16], %25 {strides = array<i32>} : memref<8x128xf32, #tpu.memory_space<vmem>>, vector<8x128xf32>,
    %c2_i32 = arith.constant 2 : i32
    %27 = arith.cmpi eq, %arg0, %c2_i32 : i32
    %28 = arith.extui %27 : i1 to i32
    %c0_i32_17 = arith.constant 0 : i32
    %29 = arith.cmpi ne, %28, %c0_i32_17 : i32
    scf.if %29 {
      %c0_18 = arith.constant 0 : index
      %c0_19 = arith.constant 0 : index
      %30 = vector.load %arg7[%c0_18, %c0_19] : memref<8x128xf32, #tpu.memory_space<vmem>>, vector<8x128xf32>
      %cst_20 = arith.constant dense<0.000000e+00> : vector<8xf32>
      %31 = vector.multi_reduction <add>, %30, %cst_20 [1] : vector<8x128xf32> to vector<8xf32>
      %32 = vector.shape_cast %31 : vector<8xf32> to vector<8x1xf32>
      %cst_21 = arith.constant dense<0.000000e+00> : vector<1xf32>
      %33 = vector.multi_reduction <add>, %32, %cst_21 [0] : vector<8x1xf32> to vector<1xf32>
      %34 = vector.shape_cast %33 : vector<1xf32> to vector<1x1xf32>
      %c0_22 = arith.constant 0 : index
      %c0_23 = arith.constant 0 : index
      %35 = vector.load %arg8[%c0_22, %c0_23] : memref<8x128xf32, #tpu.memory_space<vmem>>, vector<8x128xf32>
      %cst_24 = arith.constant dense<0.000000e+00> : vector<8xf32>
      %36 = vector.multi_reduction <add>, %35, %cst_24 [1] : vector<8x128xf32> to vector<8xf32>
      %37 = vector.shape_cast %36 : vector<8xf32> to vector<8x1xf32>
      %cst_25 = arith.constant dense<0.000000e+00> : vector<1xf32>
      %38 = vector.multi_reduction <add>, %37, %cst_25 [0] : vector<8x1xf32> to vector<1xf32>
      %39 = vector.shape_cast %38 : vector<1xf32> to vector<1x1xf32>
      %cst_26 = arith.constant 3.906250e-04 : f32
      %40 = vector.broadcast %cst_26 : f32 to vector<1x1xf32>
      %41 = arith.mulf %34, %40 : vector<1x1xf32>
      %cst_27 = arith.constant 3.906250e-04 : f32
      %42 = vector.broadcast %cst_27 : f32 to vector<1x1xf32>
      %43 = arith.mulf %39, %42 : vector<1x1xf32>
      %c0_28 = arith.constant 0 : index
      %44 = memref.load %arg1[%c0_28] : memref<1xf32, #tpu.memory_space<smem>>
      %cst_29 = arith.constant 0.000000e+00 : f32
      %45 = arith.subf %cst_29, %44 : f32
      %46 = math.exp %45 : f32
      %47 = math.exp %44 : f32
      %48 = vector.broadcast %46 : f32 to vector<1x1xf32>
      %49 = arith.mulf %48, %41 : vector<1x1xf32>
      %50 = vector.broadcast %47 : f32 to vector<1x1xf32>
      %51 = arith.mulf %50, %43 : vector<1x1xf32>
      %52 = arith.addf %49, %51 : vector<1x1xf32>
      %c0_30 = arith.constant 0 : index
      %c0_31 = arith.constant 0 : index
      %53 = vector.load %arg6[%c0_30, %c0_31] : memref<1x1xf32, #tpu.memory_space<vmem>>, vector<1x1xf32>
      tpu.vector_store %arg6[%c0_30, %c0_31], %52 {strides = array<i32>} : memref<1x1xf32, #tpu.memory_space<vmem>>, vector<1x1xf32>,
    } else {
    }
    return
  }
  func.func @transform_0(%arg0: i32) -> i32 {
    %c0_i32 = arith.constant 0 : i32
    %c0_i32_0 = arith.constant 0 : i32
    return %c0_i32 : i32
  }
  func.func @transform_1(%arg0: i32) -> (i32, i32) {
    %c0_i32 = arith.constant 0 : i32
    %c0_i32_0 = arith.constant 0 : i32
    return %arg0, %c0_i32 : i32, i32
  }
  func.func @transform_2(%arg0: i32) -> (i32, i32) {
    %c0_i32 = arith.constant 0 : i32
    %c0_i32_0 = arith.constant 0 : i32
    return %arg0, %c0_i32 : i32, i32
  }
  func.func @transform_3(%arg0: i32) -> (i32, i32) {
    %c0_i32 = arith.constant 0 : i32
    %c0_i32_0 = arith.constant 0 : i32
    return %arg0, %c0_i32 : i32, i32
  }
  func.func @transform_4(%arg0: i32) -> (i32, i32) {
    %c0_i32 = arith.constant 0 : i32
    %c0_i32_0 = arith.constant 0 : i32
    return %arg0, %c0_i32 : i32, i32
  }
  func.func @transform_5(%arg0: i32) -> (i32, i32) {
    %c0_i32 = arith.constant 0 : i32
    %c0_i32_0 = arith.constant 0 : i32
    %c0_i32_1 = arith.constant 0 : i32
    return %c0_i32, %c0_i32_0 : i32, i32
  }
}

</mosaic_0001>

<bundles_post_ra>
// kernel: tpu_custom_call.1
= control target key start
LH: loop header
LB: loop body
LE: loop exit
PB: predicated region body
PF: predicated region fallthrough
CT: control target
= control target key end

     0   :  { %s1094_s0 = inlined_call_operand.<no memory space> [shape: f32[1], index: 0, kind: input, shape index: {}]   ;;  %s1095_s1 = inlined_call_operand.hbm [shape: f32[20,128], index: 1, kind: input, shape index: {}]   ;;  %s1096_s2 = inlined_call_operand.hbm [shape: f32[20,128], index: 2, kind: input, shape index: {}]   ;;  %s1097_s3 = inlined_call_operand.hbm [shape: f32[20,128], index: 3, kind: input, shape index: {}]   ;;  %s1098_s4 = inlined_call_operand.hbm [shape: f32[20,128], index: 4, kind: input, shape index: {}]   ;;  %s1099_s5 = inlined_call_operand.hbm [shape: f32[1,1], index: 5, kind: output, shape index: {}]  }
   0x1   :  { %10 = sst [smem:[#allocation4]] %s1094_s0 }
   0x2   :  { %11 = vsyncpa [#allocation6], 0 }
   0x3   :  { %13 = vsyncpa [#allocation6 + $0x1], 0 }
   0x4   :  { %14 = vsyncpa [#allocation9], 0 }
   0x5   :  { %16 = vsyncpa [#allocation9 + $0x1], 0 }
   0x6   :  { %17 = vsyncpa [#allocation12], 0 }
   0x7   :  { %19 = vsyncpa [#allocation12 + $0x1], 0 }
   0x8   :  { %20 = vsyncpa [#allocation7], 0  ;;  %s855_s20 = smov 0   ;;  %s857_s21 = smov 0  }
   0x9   :  { %s859_s22 = smov 0   ;;  %s861_s23 = smov 0  }
   0xa LB: > { %s874_s0 = sadd.s32 4294967295, %s814_s23   ;;  %s877_s24 = sadd.s32 1, %s814_s23   ;;  %s814_s23 = sphi %s861_s23, %s1116_s23   ;;  %s810_s22 = sphi %s859_s22, %s1115_s22   ;;  %s806_s21 = sphi %s857_s21, %s1114_s21   ;;  %s802_s20 = sphi %s855_s20, %s1113_s20  }
   0xb   : > { %s51_s25 = ssub.s32 %s814_s23, %s877_s24  ;;  %s54_s26 = sadd.s32 1, %s810_s22 }
   0xc   : > { %p52_p0 = scmp.eq.s32.totalorder %s51_s25, 0  ;;  %p61_p1 = scmp.ne.s32.totalorder %s810_s22, %s806_s21 }
   0xd   : > { %p62_p2 = scmp.eq.s32.totalorder %s814_s23, 0  ;;  %p67_p3 = scmp.ne.s32.totalorder %s806_s21, %s802_s20 }
   0xe   : > { %s887_s27 = scalar_select %p52_p0, %s810_s22, %s54_s26  }
   0xf   : > { %p63_p4 = por %p62_p2, %p61_p1  ;;  %p68_p5 = scmp.eq.s32.totalorder %s874_s0, 0 }
  0x10   : > { %p581_p6 = scmp.lt.s32.totalorder %s814_s23, 3  ;;  %s896_s29 = sand.u32 1, %s810_s22  }
  0x11   : > { %p891_p7 = por %p68_p5, %p67_p3  ;;  %s899_s30 = sshll.u32 %s896_s29, 3 }
  0x12   : > { %s902_s6 = sshll.u32 %s814_s23, 7  ;;  %p904_p8 = pnand %p581_p6, %p63_p4 }
  0x13   : > { %s1103_s28 = scalar_select %p891_p7, 1, 0 }
  0x14   : > { %s1104_s7 = scalar_select %p904_p8, 1, 0 }
  0x15   : > { %s211_s8 = sand.u32 1, %s814_s23   ;;  %s913_s11 = scalar_lea.hbm %s1096_s2, %s902_s6 }
  0x16   : > { %s215_s12 = scalar_lea.vmem [#allocation8], %s899_s30  ;;  %s920_s14 = scalar_lea.sflag [#allocation9], %s211_s8 }
  0x17   : > { %s222_s13 = sshll.u32 %s215_s12, 4  ;;  %s622_s15 = scalar_lea.hbm %s913_s11, 128  ;;  %s917_s13 = int_to_ptr.vmem [resolvable:$true] %s222_s13 }
  0x18   : > { %p623_p11 = scmp.ne.s32.totalorder %s913_s11, %s622_s15  ;;  %p926_p12 = pneg %p904_p8 }
  0x19   : > { %s627_s19 = scalar_lea.hbm %s1096_s2, 384  ;;  %p628_p1 = scmp.lt.u32.totalorder %s913_s11, %s1096_s2 }
  0x1a   : > { %p625_p13 = pnand %p926_p12, %p623_p11  ;;  %p629_p2 = scmp.lt.u32.totalorder %s627_s19, %s622_s15 }
  0x1b   : > { %p631_p4 = scmp.lt.u32.totalorder %s622_s15, %s913_s11 }
  0x1c   : > { %p626_p0 = pneg %p625_p13  ;;  %p630_p3 = por %p629_p2, %p628_p1 }
  0x1e   : > { %p632_p5 = por %p631_p4, %p630_p3 }
  0x20   : > { %p633_p6 = pnand %p632_p5, %p626_p0 }
  0x22   : > { %636 = shalt.err (!%p633_p6)
}
  0x23   : > { %s637_s26 = scalar_lea.vmem %s917_s13, 128  ;;  %s816_s8 = smov [#allocation8]  }
  0x24   : > { %p638_p11 = scmp.ne.s32.totalorder %s917_s13, %s637_s26  ;;  %s642_s9 = sshll.u32 %s816_s8, 4  ;;  %s643_s9 = int_to_ptr.vmem [resolvable:$false] %s642_s9 }
  0x25   : > { %s644_s10 = scalar_lea.vmem %s643_s9, 256  ;;  %p645_p10 = scmp.lt.s32.totalorder %s917_s13, %s643_s9 }
  0x26   : > { %p640_p13 = pnand %p638_p11, %p926_p12  ;;  %p646_p7 = scmp.lt.s32.totalorder %s644_s10, %s637_s26 }
  0x28   : > { %p641_p9 = pneg %p640_p13  ;;  %p647_p1 = por %p646_p7, %p645_p10 }
  0x2a   : > { %p648_p2 = pnand %p647_p1, %p641_p9 }
  0x2c   : > { %651 = shalt.err (!%p648_p2)
}
  0x2d   : > { %574 = dma.hbm_to_vmem [thread:$0]  (!%p904_p8), %s913_s11, 128, %s917_s13, %s920_s14  }
  0x2e   : > { %p1106_p0 = scmp.lt.s32.totalorder %s814_s23, 4  ;;  %p1107_p3 = scmp.ge.s32.totalorder %s814_s23, 1 }
  0x2f   : > { %s962_s18 = scalar_lea.hbm %s1095_s1, %s902_s6  ;;  %s197_s19 = scalar_lea.vmem [#allocation5], %s899_s30 }
  0x30   : > { %p954_p4 = pnand %p1107_p3, %p1106_p0  ;;  %s204_s20 = sshll.u32 %s197_s19, 4  ;;  %s965_s20 = int_to_ptr.vmem [resolvable:$true] %s204_s20 }
  0x31   : > { %s971_s23 = scalar_lea.hbm %s1097_s3, %s902_s6  ;;  %s194_s25 = scalar_lea.sflag [#allocation6], %s896_s29 }
  0x32   : > { %s1108_s12 = scalar_select %p954_p4, 1, 0 }
  0x33   : > { %s652_s26 = scalar_lea.hbm %s962_s18, 128  ;;  %s657_s10 = scalar_lea.hbm %s1095_s1, 384 }
  0x34   : > { %p653_p7 = scmp.ne.s32.totalorder %s962_s18, %s652_s26  ;;  %p658_p5 = scmp.lt.u32.totalorder %s962_s18, %s1095_s1 }
  0x35   : > { %p659_p6 = scmp.lt.u32.totalorder %s657_s10, %s652_s26  ;;  %p661_p13 = scmp.lt.u32.totalorder %s652_s26, %s962_s18 }
  0x36   : > { %p655_p9 = pnand %p653_p7, %p926_p12 }
  0x37   : > { %p660_p11 = por %p659_p6, %p658_p5 }
  0x38   : > { %p656_p10 = pneg %p655_p9 }
  0x39   : > { %p662_p1 = por %p661_p13, %p660_p11 }
  0x3b   : > { %p663_p2 = pnand %p662_p1, %p656_p10 }
  0x3d   : > { %666 = shalt.err (!%p663_p2)
}
  0x3e   : > { %s667_s19 = scalar_lea.vmem %s965_s20, 128  ;;  %s817_s11 = smov [#allocation5]  }
  0x3f   : > { %p668_p0 = scmp.ne.s32.totalorder %s965_s20, %s667_s19  ;;  %s672_s13 = sshll.u32 %s817_s11, 4  ;;  %s673_s13 = int_to_ptr.vmem [resolvable:$false] %s672_s13 }
  0x40   : > { %s674_s8 = scalar_lea.vmem %s673_s13, 256  ;;  %p675_p9 = scmp.lt.s32.totalorder %s965_s20, %s673_s13 }
  0x41   : > { %p670_p3 = pnand %p668_p0, %p926_p12  ;;  %p676_p4 = scmp.lt.s32.totalorder %s674_s8, %s667_s19 }
  0x43   : > { %p671_p7 = pneg %p670_p3  ;;  %p677_p5 = por %p676_p4, %p675_p9 }
  0x45   : > { %p678_p6 = pnand %p677_p5, %p671_p7 }
  0x47   : > { %681 = shalt.err (!%p678_p6)
}
  0x48   : > { %571 = dma.hbm_to_vmem [thread:$0]  (!%p904_p8), %s962_s18, 128, %s965_s20, %s194_s25  }
  0x49   : > { %s233_s26 = scalar_lea.vmem [#allocation10], %s899_s30  ;;  %s682_s10 = scalar_lea.hbm %s971_s23, 128 }
  0x4a   : > { %s240_s9 = sshll.u32 %s233_s26, 4  ;;  %p683_p10 = scmp.ne.s32.totalorder %s971_s23, %s682_s10  ;;  %s241_s9 = int_to_ptr.vmem [resolvable:$true] %s240_s9 }
  0x4b   : > { %s687_s19 = scalar_lea.hbm %s1097_s3, 384  ;;  %p688_p13 = scmp.lt.u32.totalorder %s971_s23, %s1097_s3 }
  0x4c   : > { %p685_p4 = pnand %p683_p10, %p926_p12  ;;  %p689_p1 = scmp.lt.u32.totalorder %s687_s19, %s682_s10 }
  0x4d   : > { %p691_p0 = scmp.lt.u32.totalorder %s682_s10, %s971_s23 }
  0x4e   : > { %p686_p11 = pneg %p685_p4  ;;  %p690_p2 = por %p689_p1, %p688_p13 }
  0x50   : > { %p692_p3 = por %p691_p0, %p690_p2 }
  0x52   : > { %p693_p7 = pnand %p692_p3, %p686_p11 }
  0x54   : > { %696 = shalt.err (!%p693_p7)
}
  0x55   : > { %s697_s18 = scalar_lea.vmem %s241_s9, 128  ;;  %s818_s20 = smov [#allocation10]  }
  0x56   : > { %p698_p9 = scmp.ne.s32.totalorder %s241_s9, %s697_s18  ;;  %s702_s25 = sshll.u32 %s818_s20, 4  ;;  %s703_s25 = int_to_ptr.vmem [resolvable:$false] %s702_s25 }
  0x57   : > { %s704_s8 = scalar_lea.vmem %s703_s25, 256  ;;  %p705_p10 = scmp.lt.s32.totalorder %s241_s9, %s703_s25 }
  0x58   : > { %p700_p5 = pnand %p698_p9, %p926_p12  ;;  %p706_p4 = scmp.lt.s32.totalorder %s704_s8, %s697_s18 }
  0x5a   : > { %p701_p6 = pneg %p700_p5  ;;  %p707_p8 = por %p706_p4, %p705_p10 }
  0x5c   : > { %p708_p1 = pnand %p707_p8, %p701_p6 }
  0x5e   : > { %711 = shalt.err (!%p708_p1)
}
  0x5f   : > { %p1109_p13 = scmp.ne.s32.totalorder %s1104_s7, 0  ;;  %s1018_s15 = scalar_lea.hbm %s1098_s4, %s902_s6 }
  0x60   : > { %s251_s17 = scalar_lea.vmem [#allocation11], %s899_s30  ;;  %s248_s11 = scalar_lea.sflag [#allocation12], %s896_s29 }
  0x61   : > { %577 = dma.hbm_to_vmem [thread:$0]  (!%p1109_p13), %s971_s23, 128, %s241_s9, %s920_s14  }
  0x62   : > { %s258_s19 = sshll.u32 %s251_s17, 4  ;;  %s712_s13 = scalar_lea.hbm %s1018_s15, 128  ;;  %s259_s19 = int_to_ptr.vmem [resolvable:$true] %s258_s19 }
  0x63   : > { %p713_p8 = scmp.ne.s32.totalorder %s1018_s15, %s712_s13  ;;  %s717_s23 = scalar_lea.hbm %s1098_s4, 384 }
  0x64   : > { %p718_p0 = scmp.lt.u32.totalorder %s1018_s15, %s1098_s4  ;;  %p719_p3 = scmp.lt.u32.totalorder %s717_s23, %s712_s13 }
  0x65   : > { %p715_p11 = pnand %p713_p8, %p926_p12  ;;  %p721_p9 = scmp.lt.u32.totalorder %s712_s13, %s1018_s15 }
  0x66   : > { %p720_p7 = por %p719_p3, %p718_p0 }
  0x67   : > { %p716_p2 = pneg %p715_p11 }
  0x68   : > { %p722_p5 = por %p721_p9, %p720_p7 }
  0x6a   : > { %p723_p6 = pnand %p722_p5, %p716_p2 }
  0x6c   : > { %726 = shalt.err (!%p723_p6)
}
  0x6d   : > { %s727_s29 = scalar_lea.vmem %s259_s19, 128  ;;  %s819_s30 = smov [#allocation11]  }
  0x6e   : > { %p728_p10 = scmp.ne.s32.totalorder %s259_s19, %s727_s29  ;;  %s732_s20 = sshll.u32 %s819_s30, 4  ;;  %s733_s20 = int_to_ptr.vmem [resolvable:$false] %s732_s20 }
  0x6f   : > { %s734_s25 = scalar_lea.vmem %s733_s20, 256  ;;  %p735_p8 = scmp.lt.s32.totalorder %s259_s19, %s733_s20 }
  0x70   : > { %p730_p4 = pnand %p728_p10, %p926_p12  ;;  %p736_p11 = scmp.lt.s32.totalorder %s734_s25, %s727_s29 }
  0x72   : > { %p731_p1 = pneg %p730_p4  ;;  %p737_p13 = por %p736_p11, %p735_p8 }
  0x74   : > { %p738_p0 = pnand %p737_p13, %p731_p1 }
  0x76   : > { %741 = shalt.err (!%p738_p0)
}
  0x77   : > { %p1110_p3 = scmp.ne.s32.totalorder %s1104_s7, 0  ;;  %p1111_p2 = scmp.ne.s32.totalorder %s1108_s12, 0 }
  0x78   : > { %s269_s16 = sand.u32 (!%p1111_p2), 1, %s806_s21   ;;  %p1112_p12 = scmp.ne.s32.totalorder (!%p1111_p2), %s1103_s28, 0 }
  0x79   : > { %580 = dma.hbm_to_vmem [thread:$0]  (!%p1110_p3), %s1018_s15, 128, %s259_s19, %s248_s11  }
  0x7a   : > { %267 = sbr.rel (%p1111_p2) target bundleno = 353 (0x161), region = 40  ;;  %s541_s8 = sshll.u32 (!%p1111_p2), %s269_s16, 3 }
  0x7b   : > { %s270_s26 = scalar_lea.sflag (!%p1111_p2), [#allocation6], %s269_s16  ;;  %s273_s10 = scalar_lea.vmem (!%p1111_p2), [#allocation5], %s541_s8 }
  0x81   : > { %785 = dma.done.wait (%p1112_p12), %s270_s26, 128  }
  0x82   : > { %787 = vsyncadd (%p1112_p12), %s270_s26, 4294967168  ;;  %s278_s17 = sand.u32 1, %s874_s0   ;;  %s282_s13 = scalar_lea.vmem [#allocation8], %s541_s8 }
  0x83   : > { %s279_s7 = scalar_lea.sflag [#allocation9], %s278_s17 }
  0x84   : > { %789 = dma.done.wait (%p1112_p12), %s279_s7, 256  }
  0x85   : > { %791 = vsyncadd (%p1112_p12), %s279_s7, 4294967040  ;;  %s291_s12 = scalar_lea.vmem [#allocation10], %s541_s8  ;;  %s297_s15 = scalar_lea.sflag [#allocation12], %s269_s16 }
  0x86   : > { %s300_s19 = scalar_lea.vmem [#allocation11], %s541_s8 }
  0x87   : > { %793 = dma.done.wait (%p1112_p12), %s297_s15, 128  }
  0x88   : > { %795 = vsyncadd (%p1112_p12), %s297_s15, 4294967168  ;;  %p545_p13 = scmp.ne.s32.totalorder %s874_s0, 0 }
  0x89   : > { %v820_v0 = vmov (!%p545_p13), 0.0  }
  0x8a   : > { %340 = sbr.rel (%p545_p13) target bundleno = 145 (0x91), region = 60  ;;  %341 = vst [vmem:[#allocation2] sm:$0xff] (!%p545_p13), %v820_v0  ;;  %342 = vst [vmem:[#allocation3] sm:$0xff] (!%p545_p13), %v820_v0 }
  0x91 PF: > { %v343_v1 = vld [vmem:[%s273_s10] sm:$0xff]  ;;  %v344_v2 = vld [vmem:[%s282_s13] sm:$0xff]  ;;  %s546_s11 = sshll.u32 %s874_s0, 3  ;;  %v352_v3 = vlaneseq  ;;  %p547_p7 = scmp.ne.s32.totalorder %s874_s0, 2 }
  0x92   : > { %v345_v4 = vsub.f32 %v343_v1, %v344_v2  ;;  %v354_v5 = vstv %s546_s11  ;;  %v346_v6 = vld [vmem:[%s291_s12] sm:$0xff]  ;;  %v347_v7 = vld [vmem:[%s300_s19] sm:$0xff]  ;;  %s389_s28 = sld [smem:[#allocation4]] (!%p547_p7)  ;;  %vm404_vm1 = vcmask (!%p547_p7), 0  }
  0x93   : > { %v353_v8 = vshrl.u32 %v352_v3, 7  ;;  %v348_v9 = vsub.f32 %v346_v6, %v347_v7  ;;  %v359_v13 = vld [vmem:[#allocation2] sm:$0xff]  ;;  %v362_v14 = vld [vmem:[#allocation3] sm:$0xff] }
  0x94   : > { %v349_v10 = vmul.f32 %v345_v4, %v345_v4 }
  0x95   : > { %v355_v11 = vadd.s32 %v354_v5, %v353_v8  ;;  %v350_v12 = vmul.f32 %v348_v9, %v348_v9  ;;  %368 = sbr.rel (%p547_p7) target bundleno = 328 (0x148), region = 64 }
  0x97   : > { %vm356_vm0 = vcmp.lt.s32.totalorder %v355_v11, 20 }
  0x98   : > { %v357_v15 = vsel %vm356_vm0, %v349_v10, 0.0  ;;  %v358_v16 = vsel %vm356_vm0, %v350_v12, 0.0  ;;  %s390_s18 = ssub.f32 (!%p547_p7), 0.0, %s389_s28  ;;  %v395_v21 = vstv (!%p547_p7), %s389_s28 }
  0x99   : > { %v360_v17 = vadd.f32 %v359_v13, %v357_v15  ;;  %v363_v18 = vadd.f32 %v362_v14, %v358_v16  ;;  %v396_v22 = vmul.f32 (!%p547_p7), 1.442695, %v395_v21 }
  0x9a   : > { %v391_v23 = vstv (!%p547_p7), %s390_s18 }
  0x9b   : > { %361 = vst [vmem:[#allocation2] sm:$0xff] %v360_v17  ;;  %364 = vst [vmem:[#allocation3] sm:$0xff] %v363_v18  ;;  %v392_v24 = vmul.f32 (!%p547_p7), 1.442695, %v391_v23  ;;  %618 = vpow2.f32 (!%p547_p7), %v396_v22 }
  0x9d   : > { %620 = vpow2.f32 %v392_v24 }
  0xa2   : > { %v369_v19 = vld [vmem:[#allocation2] sm:$0xff]  ;;  %v378_v20 = vld [vmem:[#allocation3] sm:$0xff] }
  0xa3   : > { %370 = vadd.xlane.f32.xlu0 %v369_v19 }
  0xa5   : > { %v619_v25 = vpop.eup %618 }
  0xa7   : > { %379 = vadd.xlane.f32.xlu0 %v378_v20  ;;  %v621_v26 = vpop.eup %620 }
  0xa8   : > { %552 = vpush %v621_v26 }
  0xa9   : > { %554 = vpush %v619_v25 }
  0xd9   : > { %s553_s14 = spop %552 }
  0xda   : > { %s555_s23 = spop %554  ;;  %v399_v42 = vstv %s553_s14 }
  0xdb   : > { %v401_v43 = vstv %s555_s23 }
 0x130   : > { %v371_v27 = vpop.xlane.xlu0 %370 }
 0x131   : > { %v372_v28 = vrot.slane %v371_v27, 4 }
 0x133   : > { %v373_v29 = vadd.f32 %v372_v28, %v371_v27 }
 0x134   : > { %v380_v30 = vpop.xlane.xlu0 %379 }
 0x135   : > { %v374_v31 = vrot.slane %v373_v29, 2  ;;  %v381_v32 = vrot.slane %v380_v30, 4 }
 0x137   : > { %v375_v33 = vadd.f32 %v374_v31, %v373_v29  ;;  %v382_v34 = vadd.f32 %v381_v32, %v380_v30 }
 0x139   : > { %v376_v35 = vrot.slane %v375_v33, 1  ;;  %v383_v36 = vrot.slane %v382_v34, 2 }
 0x13b   : > { %v384_v37 = vadd.f32 %v383_v36, %v382_v34  ;;  %v377_v38 = vadd.f32 %v376_v35, %v375_v33 }
 0x13d   : > { %v385_v39 = vrot.slane %v384_v37, 1  ;;  %v387_v40 = vmul.f32 0.000390625, %v377_v38 }
 0x13f   : > { %v386_v41 = vadd.f32 %v385_v39, %v384_v37  ;;  %v400_v45 = vmul.f32 %v399_v42, %v387_v40 }
 0x141   : > { %v388_v44 = vmul.f32 0.000390625, %v386_v41 }
 0x143   : > { %v402_v46 = vmul.f32 %v401_v43, %v388_v44 }
 0x145   : > { %v403_v47 = vadd.f32 %v402_v46, %v400_v45 }
 0x147   : > { %405 = vst.msk [vmem:[#allocation13] sm:$0x1] %vm404_vm1, %v403_v47 }
 0x148 PF: > { %p582_p9 = scmp.eq.s32.totalorder %s874_s0, 2  ;;  %s821_s9 = smov [#allocation13]  }
 0x149   : > { %s413_s6 = sshll.u32 %s821_s9, 4  ;;  %s414_s6 = int_to_ptr.vmem [resolvable:$true] %s413_s6 }
 0x14a   : > { %s742_s29 = scalar_lea.vmem %s414_s6, 16  ;;  %s748_s30 = scalar_lea.vmem %s414_s6, 32 }
 0x14b   : > { %p743_p5 = scmp.ne.s32.totalorder %s414_s6, %s742_s29  ;;  %p749_p4 = scmp.lt.s32.totalorder %s414_s6, %s414_s6 }
 0x14c   : > { %p750_p1 = scmp.lt.s32.totalorder %s748_s30, %s742_s29 }
 0x14d   : > { %p744_p6 = pnand %p743_p5, %p582_p9 }
 0x14e   : > { %p751_p8 = por %p750_p1, %p749_p4 }
 0x14f   : > { %p745_p10 = pneg %p744_p6 }
 0x151   : > { %p752_p11 = pnand %p751_p8, %p745_p10 }
 0x153   : > { %755 = shalt.err (!%p752_p11)
}
 0x154   : > { %s756_s16 = scalar_lea.hbm %s1099_s5, 16 }
 0x155   : > { %p757_p0 = scmp.ne.s32.totalorder %s1099_s5, %s756_s16  ;;  %p762_p12 = scmp.lt.u32.totalorder %s756_s16, %s1099_s5 }
 0x157   : > { %p758_p3 = pnand %p757_p0, %p582_p9 }
 0x159   : > { %p759_p2 = pneg %p758_p3 }
 0x15b   : > { %p764_p13 = pnand %p762_p12, %p759_p2 }
 0x15d   : > { %767 = shalt.err (!%p764_p13)
}
 0x15e   : > { %565 = dma.vmem_to_hbm [thread:$0]  (%p582_p9), %s414_s6, 16, %s1099_s5, [#allocation7]  }
 0x15f   : > { %797 = dma.done.wait (%p582_p9), [#allocation7], 16  }
 0x160   : > { %799 = vsyncadd (%p582_p9), [#allocation7], 4294967280 }
 0x161 PF: > { %p23_p7 = scmp.ge.s32.totalorder %s877_s24, 5   ;;  %s1113_s20 = smov %s806_s21 }
 0x162   : > { %s1114_s21 = smov %s810_s22  ;;  %s1115_s22 = smov %s887_s27 }
 0x163   : > { %s1116_s23 = smov %s877_s24  ;;  %25 = sbr.rel (!%p23_p7) target bundleno = 10 (0xa), region = 122 }
 0x16a   :  { %426 = vsyncpa [#allocation6], 1 }
 0x16b   :  { %428 = vsyncpa [#allocation6 + $0x1], 1 }
 0x16c   :  { %429 = vsyncpa [#allocation9], 1 }
 0x16d   :  { %431 = vsyncpa [#allocation9 + $0x1], 1 }
 0x16e   :  { %432 = vsyncpa [#allocation12], 1 }
 0x16f   :  { %434 = vsyncpa [#allocation12 + $0x1], 1 }
 0x170   :  { %435 = vsyncpa [#allocation7], 1 }
 0x171   :  { %437 = vsyncpa [#allocation7 + $0x1], 1 }

</bundles_post_ra>
